<compile_context>
chip_gen: v6e
topology: v6e:2x2x1
jax: 0.10.0
libtpu: 0.0.40
codegen_flags: <defaults>
</compile_context>

<pallas_src>
import jax
import jax.numpy as jnp
from jax.experimental import pallas as pl
from jax.experimental.pallas import tpu as pltpu

MXU_DTYPE = jnp.bfloat16   # MXU operand / inter-stage dtype; accumulation is f32

K1_PAD = 80     # conv1 contraction 3*5*5=75  -> 80  (bf16 sublane multiple)
K2_PAD = 160    # conv2 contraction 6*5*5=150 -> 160
NFCP = 128      # fc lane width (120/84/10 -> 128)


def _round_up(x, m):
    return (x + m - 1) // m * m


def _m_steps():
    """v7x has 2 TensorCores/chip -> keep a 2-step 'parallel' M grid there;
    single-TC chips (v5e/v6e) use 1 step to minimize pipeline overhead."""
    try:
        kind = jax.devices()[0].device_kind.lower()
    except Exception:
        kind = ""
    return 2 if ("v7" in kind or "7x" in kind) else 1


# ---------------------------------------------------------------------------
# Pallas kernels
# ---------------------------------------------------------------------------
def _conv_relu_kernel(w_ref, p_ref, b_ref, o_ref):
    # (OCp, K) @ (K, m_tile) on the MXU (bf16 in, f32 acc); bias+ReLU on VPU.
    acc = jnp.dot(w_ref[...], p_ref[...], preferred_element_type=jnp.float32)
    o_ref[...] = jnp.maximum(acc + b_ref[...], 0.0).astype(o_ref.dtype)


def _pool_conv_relu_kernel(w_ref, t00, t01, t10, t11, b_ref, o_ref):
    # 2x2 max-pool fused into the consumer conv: the 4 pool taps arrive already
    # im2col'ed (elementwise max commutes with the gather).
    p = jnp.maximum(jnp.maximum(t00[...], t01[...]),
                    jnp.maximum(t10[...], t11[...]))
    acc = jnp.dot(w_ref[...], p, preferred_element_type=jnp.float32)
    o_ref[...] = jnp.maximum(acc + b_ref[...], 0.0).astype(o_ref.dtype)


def _pool_fc_head_kernel(f_ref, w1, b1, w2, b2, w3, b3, o_ref):
    # pool2 (max of 4 pre-gathered flattened taps) + fc1 + ReLU + fc2 + ReLU + fc3,
    # all resident in VMEM.
    h = jnp.maximum(jnp.maximum(f_ref[0], f_ref[1]),
                    jnp.maximum(f_ref[2], f_ref[3]))
    h1 = jnp.maximum(
        jnp.dot(h, w1[...], preferred_element_type=jnp.float32) + b1[...], 0.0)
    h2 = jnp.maximum(
        jnp.dot(h1.astype(MXU_DTYPE), w2[...],
                preferred_element_type=jnp.float32) + b2[...], 0.0)
    o_ref[...] = jnp.dot(h2.astype(MXU_DTYPE), w3[...],
                         preferred_element_type=jnp.float32) + b3[...]


# ---------------------------------------------------------------------------
# pallas_call wrappers
# ---------------------------------------------------------------------------
def conv_relu_pallas(w_packed, bias_col, patches, m_tile):
    OCp, Kp = w_packed.shape
    _, Mp = patches.shape
    return pl.pallas_call(
        _conv_relu_kernel,
        out_shape=jax.ShapeDtypeStruct((OCp, Mp), MXU_DTYPE),
        grid=(Mp // m_tile,),
        in_specs=[
            pl.BlockSpec((OCp, Kp), lambda j: (0, 0)),      # weights resident
            pl.BlockSpec((Kp, m_tile), lambda j: (0, j)),   # patch tile
            pl.BlockSpec((OCp, 1), lambda j: (0, 0)),       # bias resident
        ],
        out_specs=pl.BlockSpec((OCp, m_tile), lambda j: (0, j)),
        compiler_params=pltpu.CompilerParams(dimension_semantics=("parallel",)),
    )(w_packed, patches, bias_col)


def pool_conv_relu_pallas(w_packed, bias_col, taps, m_tile):
    OCp, Kp = w_packed.shape
    _, Mp = taps[0].shape
    tap_spec = pl.BlockSpec((Kp, m_tile), lambda j: (0, j))
    return pl.pallas_call(
        _pool_conv_relu_kernel,
        out_shape=jax.ShapeDtypeStruct((OCp, Mp), MXU_DTYPE),
        grid=(Mp // m_tile,),
        in_specs=[pl.BlockSpec((OCp, Kp), lambda j: (0, 0))]
                 + [tap_spec] * 4
                 + [pl.BlockSpec((OCp, 1), lambda j: (0, 0))],
        out_specs=pl.BlockSpec((OCp, m_tile), lambda j: (0, j)),
        compiler_params=pltpu.CompilerParams(dimension_semantics=("parallel",)),
    )(w_packed, *taps, bias_col)


def head_pallas(taps3, w1, b1, w2, b2, w3, b3):
    _, BP, F = taps3.shape
    N = w3.shape[1]
    full2 = lambda shp: pl.BlockSpec(shp, lambda i: (0, 0))
    return pl.pallas_call(
        _pool_fc_head_kernel,
        out_shape=jax.ShapeDtypeStruct((BP, N), jnp.float32),
        grid=(1,),
        in_specs=[pl.BlockSpec((4, BP, F), lambda i: (0, 0, 0)),
                  full2(w1.shape), full2(b1.shape),
                  full2(w2.shape), full2(b2.shape),
                  full2(w3.shape), full2(b3.shape)],
        out_specs=full2((BP, N)),
        compiler_params=pltpu.CompilerParams(dimension_semantics=("arbitrary",)),
    )(taps3, w1, b1, w2, b2, w3, b3)


# ---------------------------------------------------------------------------
# Host-side glue: channel-major im2col (lane-dense, zero-padded, bf16)
# ---------------------------------------------------------------------------
def im2col_cm(x_cm, KH, KW, k_pad, m_pad, dtype):
    """x_cm is channel-major (C, B, H, W). Returns (k_pad, m_pad) patch matrix:
    rows ordered c*KH*KW + kh*KW + kw (matches PyTorch weight.reshape(OC, C*KH*KW)),
    columns ordered (b, oh, ow); zero-padded to (k_pad, m_pad)."""
    C, B, H, W = x_cm.shape
    OH, OW = H - KH + 1, W - KW + 1
    taps = [x_cm[:, :, kh:kh + OH, kw:kw + OW]
            for kh in range(KH) for kw in range(KW)]
    p = jnp.stack(taps, axis=1)                    # (C, KH*KW, B, OH, OW)
    p = p.reshape(C * KH * KW, B * OH * OW)
    p = jnp.pad(p, ((0, k_pad - p.shape[0]), (0, m_pad - p.shape[1])))
    return p.astype(dtype)


# ---------------------------------------------------------------------------
# Full forward pass (mirrors Net.forward)
# ---------------------------------------------------------------------------
def net_forward(x, pk):
    B, _, H, W = x.shape
    OH1, OW1 = H - 4, W - 4            # conv1 output (28x28 for 32x32)
    PH1, PW1 = OH1 // 2, OW1 // 2      # pool1 output (14x14)
    OH2, OW2 = PH1 - 4, PW1 - 4        # conv2 output (10x10)
    PH2, PW2 = OH2 // 2, OW2 // 2      # pool2 output (5x5)

    n_steps = _m_steps()

    # ---- stage 1: conv1 + bias + ReLU (channel-major, bf16 everywhere) ----
    x_cm = x.transpose(1, 0, 2, 3)                                # (C, B, H, W)
    M1 = B * OH1 * OW1
    M1p = _round_up(M1, 128 * n_steps)
    patches1 = im2col_cm(x_cm, 5, 5, K1_PAD, M1p, MXU_DTYPE)
    y1 = conv_relu_pallas(pk["w1"], pk["b1"], patches1, M1p // n_steps)  # (8, M1p) bf16
    y1cm = y1[:6, :M1].reshape(6, B, OH1, OW1)                    # stays channel-major

    # ---- stage 2: pool1 (fused in-kernel) + conv2 + bias + ReLU ------------
    M2 = B * OH2 * OW2
    M2p = _round_up(M2, 128 * n_steps)
    taps2 = [im2col_cm(y1cm[:, :, k::2, l::2], 5, 5, K2_PAD, M2p, MXU_DTYPE)
             for k in range(2) for l in range(2)]
    y2 = pool_conv_relu_pallas(pk["w2"], pk["b2"], taps2, M2p // n_steps)  # (16, M2p) bf16
    y2cm = y2[:, :M2].reshape(16, B, OH2, OW2)                    # channel-major

    # ---- stage 3: pool2 (fused) + flatten + fc1/fc2/fc3 --------------------
    feat = 16 * PH2 * PW2                        # 400, same order as .view(-1, 400)
    BP = _round_up(B, 8)
    taps3 = jnp.stack(
        [y2cm[:, :, i::2, j::2].transpose(1, 0, 2, 3).reshape(B, feat)
         for i in range(2) for j in range(2)], axis=0)            # (4, B, 400) bf16
    taps3 = jnp.pad(taps3, ((0, 0), (0, BP - B), (0, 0)))
    out = head_pallas(taps3, pk["fc1_w"], pk["fc1_b"],
                      pk["fc2_w"], pk["fc2_b"],
                      pk["fc3_w"], pk["fc3_b"])                   # (BP, 128) f32
    return out[:B, :10]


# ---------------------------------------------------------------------------
# Parameter init (PyTorch-default style) and one-time packing
# ---------------------------------------------------------------------------
def init_params(key):
    keys = jax.random.split(key, 10)

    def uni(k, shape, fan_in):
        bound = 1.0 / jnp.sqrt(jnp.float32(fan_in))
        return jax.random.uniform(k, shape, jnp.float32, -bound, bound)

    return {
        "conv1_w": uni(keys[0], (6, 3, 5, 5), 3 * 5 * 5),
        "conv1_b": uni(keys[1], (6,), 3 * 5 * 5),
        "conv2_w": uni(keys[2], (16, 6, 5, 5), 6 * 5 * 5),
        "conv2_b": uni(keys[3], (16,), 6 * 5 * 5),
        "fc1_w": uni(keys[4], (120, 400), 400),
        "fc1_b": uni(keys[5], (120,), 400),
        "fc2_w": uni(keys[6], (84, 120), 120),
        "fc2_b": uni(keys[7], (84,), 120),
        "fc3_w": uni(keys[8], (10, 84), 84),
        "fc3_b": uni(keys[9], (10,), 84),
    }


def pack_params(p):
    """Pre-pad / pre-transpose / pre-cast all weights ONCE.  K padding is only
    to bf16 sublane multiples (80 / 160); zero padding keeps the extra rows and
    lanes exactly zero through bias + ReLU."""
    def pad2(a, shape):
        return jnp.pad(a, ((0, shape[0] - a.shape[0]), (0, shape[1] - a.shape[1])))

    return {
        "w1": pad2(p["conv1_w"].reshape(6, 75), (8, K1_PAD)).astype(MXU_DTYPE),
        "b1": jnp.pad(p["conv1_b"], (0, 2)).reshape(8, 1).astype(jnp.float32),
        "w2": pad2(p["conv2_w"].reshape(16, 150), (16, K2_PAD)).astype(MXU_DTYPE),
        "b2": p["conv2_b"].reshape(16, 1).astype(jnp.float32),
        "fc1_w": pad2(p["fc1_w"].T, (400, NFCP)).astype(MXU_DTYPE),
        "fc1_b": jnp.pad(p["fc1_b"], (0, NFCP - 120)).reshape(1, NFCP).astype(jnp.float32),
        "fc2_w": pad2(p["fc2_w"].T, (NFCP, NFCP)).astype(MXU_DTYPE),
        "fc2_b": jnp.pad(p["fc2_b"], (0, NFCP - 84)).reshape(1, NFCP).astype(jnp.float32),
        "fc3_w": pad2(p["fc3_w"].T, (NFCP, NFCP)).astype(MXU_DTYPE),
        "fc3_b": jnp.pad(p["fc3_b"], (0, NFCP - 10)).reshape(1, NFCP).astype(jnp.float32),
    }


if __name__ == "__main__":
    key = jax.random.PRNGKey(0)
    k_x, k_p = jax.random.split(key)
    # The module implies 3-channel 32x32 inputs (16*5*5 flatten after 2 conv+pool).
    x = jax.random.normal(k_x, (2, 3, 32, 32), dtype=jnp.float32)
    params = init_params(k_p)
    packed = pack_params(params)

    fwd = jax.jit(net_forward)
    out = jax.block_until_ready(fwd(x, packed))
    assert out.shape == (2, 10), out.shape
    assert bool(jnp.all(jnp.isfinite(out)))
    print("KERNEL_OK")
</pallas_src>

<mosaic_0001>
module attributes {stable_mosaic.version = 11 : i64} {
  func.func @_conv_relu_kernel(%arg0: i32, %arg1: memref<8x80xbf16, #tpu.memory_space<vmem>>, %arg2: memref<80x1664xbf16, #tpu.memory_space<vmem>>, %arg3: memref<8x1xf32, #tpu.memory_space<vmem>>, %arg4: memref<8x1664xbf16, #tpu.memory_space<vmem>>) attributes {dimension_semantics = [#tpu.dimension_semantics<parallel>], iteration_bounds = array<i64: 1>, scalar_prefetch = 0 : i64, scratch_operands = 0 : i64, tpu.core_type = #tpu.core_type<tc>, window_params = [{pipeline_mode = #tpu.pipeline_mode<synchronous>, transform_indices = @transform_0, window_bounds = array<i64: 8, 80>}, {transform_indices = @transform_1, window_bounds = array<i64: 80, 1664>}, {pipeline_mode = #tpu.pipeline_mode<synchronous>, transform_indices = @transform_2, window_bounds = array<i64: 8, 1>}, {transform_indices = @transform_3, window_bounds = array<i64: 8, 1664>}]} {
    %c0 = arith.constant 0 : index
    %c0_0 = arith.constant 0 : index
    %0 = vector.load %arg1[%c0, %c0_0] : memref<8x80xbf16, #tpu.memory_space<vmem>>, vector<8x80xbf16>
    %c0_1 = arith.constant 0 : index
    %c0_2 = arith.constant 0 : index
    %1 = vector.load %arg2[%c0_1, %c0_2] : memref<80x1664xbf16, #tpu.memory_space<vmem>>, vector<80x1664xbf16>
    %cst = arith.constant dense<0.000000e+00> : vector<8x1664xf32>
    %2 = tpu.matmul %0, %1, %cst {dimension_numbers = #tpu.dot_dimension_numbers<[1], [0], [0], [1], [0, 0, 1, 1], [], []>} : vector<8x80xbf16>, vector<80x1664xbf16>, vector<8x1664xf32> -> vector<8x1664xf32>
    %c0_3 = arith.constant 0 : index
    %c0_4 = arith.constant 0 : index
    %3 = vector.load %arg3[%c0_3, %c0_4] : memref<8x1xf32, #tpu.memory_space<vmem>>, vector<8x1xf32>
    %4 = vector.broadcast %3 : vector<8x1xf32> to vector<8x1664xf32>
    %5 = arith.addf %2, %4 : vector<8x1664xf32>
    %cst_5 = arith.constant 0.000000e+00 : f32
    %6 = vector.broadcast %cst_5 : f32 to vector<8x1664xf32>
    %7 = arith.maximumf %5, %6 : vector<8x1664xf32>
    %8 = arith.truncf %7 : vector<8x1664xf32> to vector<8x1664xbf16>
    %c0_6 = arith.constant 0 : index
    %c0_7 = arith.constant 0 : index
    %9 = vector.load %arg4[%c0_6, %c0_7] : memref<8x1664xbf16, #tpu.memory_space<vmem>>, vector<8x1664xbf16>
    tpu.vector_store %arg4[%c0_6, %c0_7], %8 {strides = array<i32>} : memref<8x1664xbf16, #tpu.memory_space<vmem>>, vector<8x1664xbf16>,
    return
  }
  func.func @transform_0(%arg0: i32) -> (i32, i32) {
    %c0_i32 = arith.constant 0 : i32
    %c0_i32_0 = arith.constant 0 : i32
    %c0_i32_1 = arith.constant 0 : i32
    return %c0_i32, %c0_i32_0 : i32, i32
  }
  func.func @transform_1(%arg0: i32) -> (i32, i32) {
    %c0_i32 = arith.constant 0 : i32
    %c0_i32_0 = arith.constant 0 : i32
    return %c0_i32, %arg0 : i32, i32
  }
  func.func @transform_2(%arg0: i32) -> (i32, i32) {
    %c0_i32 = arith.constant 0 : i32
    %c0_i32_0 = arith.constant 0 : i32
    %c0_i32_1 = arith.constant 0 : i32
    return %c0_i32, %c0_i32_0 : i32, i32
  }
  func.func @transform_3(%arg0: i32) -> (i32, i32) {
    %c0_i32 = arith.constant 0 : i32
    %c0_i32_0 = arith.constant 0 : i32
    return %c0_i32, %arg0 : i32, i32
  }
}

module attributes {stable_mosaic.version = 11 : i64} {
  func.func @_pool_conv_relu_kernel(%arg0: i32, %arg1: memref<16x160xbf16, #tpu.memory_space<vmem>>, %arg2: memref<160x256xbf16, #tpu.memory_space<vmem>>, %arg3: memref<160x256xbf16, #tpu.memory_space<vmem>>, %arg4: memref<160x256xbf16, #tpu.memory_space<vmem>>, %arg5: memref<160x256xbf16, #tpu.memory_space<vmem>>, %arg6: memref<16x1xf32, #tpu.memory_space<vmem>>, %arg7: memref<16x256xbf16, #tpu.memory_space<vmem>>) attributes {dimension_semantics = [#tpu.dimension_semantics<parallel>], iteration_bounds = array<i64: 1>, scalar_prefetch = 0 : i64, scratch_operands = 0 : i64, tpu.core_type = #tpu.core_type<tc>, window_params = [{pipeline_mode = #tpu.pipeline_mode<synchronous>, transform_indices = @transform_0, window_bounds = array<i64: 16, 160>}, {transform_indices = @transform_1, window_bounds = array<i64: 160, 256>}, {transform_indices = @transform_2, window_bounds = array<i64: 160, 256>}, {transform_indices = @transform_3, window_bounds = array<i64: 160, 256>}, {transform_indices = @transform_4, window_bounds = array<i64: 160, 256>}, {pipeline_mode = #tpu.pipeline_mode<synchronous>, transform_indices = @transform_5, window_bounds = array<i64: 16, 1>}, {transform_indices = @transform_6, window_bounds = array<i64: 16, 256>}]} {
    %c0 = arith.constant 0 : index
    %c0_0 = arith.constant 0 : index
    %0 = vector.load %arg2[%c0, %c0_0] : memref<160x256xbf16, #tpu.memory_space<vmem>>, vector<160x256xbf16>
    %c0_1 = arith.constant 0 : index
    %c0_2 = arith.constant 0 : index
    %1 = vector.load %arg3[%c0_1, %c0_2] : memref<160x256xbf16, #tpu.memory_space<vmem>>, vector<160x256xbf16>
    %2 = arith.maximumf %0, %1 : vector<160x256xbf16>
    %c0_3 = arith.constant 0 : index
    %c0_4 = arith.constant 0 : index
    %3 = vector.load %arg4[%c0_3, %c0_4] : memref<160x256xbf16, #tpu.memory_space<vmem>>, vector<160x256xbf16>
    %c0_5 = arith.constant 0 : index
    %c0_6 = arith.constant 0 : index
    %4 = vector.load %arg5[%c0_5, %c0_6] : memref<160x256xbf16, #tpu.memory_space<vmem>>, vector<160x256xbf16>
    %5 = arith.maximumf %3, %4 : vector<160x256xbf16>
    %6 = arith.maximumf %2, %5 : vector<160x256xbf16>
    %c0_7 = arith.constant 0 : index
    %c0_8 = arith.constant 0 : index
    %7 = vector.load %arg1[%c0_7, %c0_8] : memref<16x160xbf16, #tpu.memory_space<vmem>>, vector<16x160xbf16>
    %cst = arith.constant dense<0.000000e+00> : vector<16x256xf32>
    %8 = tpu.matmul %7, %6, %cst {dimension_numbers = #tpu.dot_dimension_numbers<[1], [0], [0], [1], [0, 0, 1, 1], [], []>} : vector<16x160xbf16>, vector<160x256xbf16>, vector<16x256xf32> -> vector<16x256xf32>
    %c0_9 = arith.constant 0 : index
    %c0_10 = arith.constant 0 : index
    %9 = vector.load %arg6[%c0_9, %c0_10] : memref<16x1xf32, #tpu.memory_space<vmem>>, vector<16x1xf32>
    %10 = vector.broadcast %9 : vector<16x1xf32> to vector<16x256xf32>
    %11 = arith.addf %8, %10 : vector<16x256xf32>
    %cst_11 = arith.constant 0.000000e+00 : f32
    %12 = vector.broadcast %cst_11 : f32 to vector<16x256xf32>
    %13 = arith.maximumf %11, %12 : vector<16x256xf32>
    %14 = arith.truncf %13 : vector<16x256xf32> to vector<16x256xbf16>
    %c0_12 = arith.constant 0 : index
    %c0_13 = arith.constant 0 : index
    %15 = vector.load %arg7[%c0_12, %c0_13] : memref<16x256xbf16, #tpu.memory_space<vmem>>, vector<16x256xbf16>
    tpu.vector_store %arg7[%c0_12, %c0_13], %14 {strides = array<i32>} : memref<16x256xbf16, #tpu.memory_space<vmem>>, vector<16x256xbf16>,
    return
  }
  func.func @transform_0(%arg0: i32) -> (i32, i32) {
    %c0_i32 = arith.constant 0 : i32
    %c0_i32_0 = arith.constant 0 : i32
    %c0_i32_1 = arith.constant 0 : i32
    return %c0_i32, %c0_i32_0 : i32, i32
  }
  func.func @transform_1(%arg0: i32) -> (i32, i32) {
    %c0_i32 = arith.constant 0 : i32
    %c0_i32_0 = arith.constant 0 : i32
    return %c0_i32, %arg0 : i32, i32
  }
  func.func @transform_2(%arg0: i32) -> (i32, i32) {
    %c0_i32 = arith.constant 0 : i32
    %c0_i32_0 = arith.constant 0 : i32
    return %c0_i32, %arg0 : i32, i32
  }
  func.func @transform_3(%arg0: i32) -> (i32, i32) {
    %c0_i32 = arith.constant 0 : i32
    %c0_i32_0 = arith.constant 0 : i32
    return %c0_i32, %arg0 : i32, i32
  }
  func.func @transform_4(%arg0: i32) -> (i32, i32) {
    %c0_i32 = arith.constant 0 : i32
    %c0_i32_0 = arith.constant 0 : i32
    return %c0_i32, %arg0 : i32, i32
  }
  func.func @transform_5(%arg0: i32) -> (i32, i32) {
    %c0_i32 = arith.constant 0 : i32
    %c0_i32_0 = arith.constant 0 : i32
    %c0_i32_1 = arith.constant 0 : i32
    return %c0_i32, %c0_i32_0 : i32, i32
  }
  func.func @transform_6(%arg0: i32) -> (i32, i32) {
    %c0_i32 = arith.constant 0 : i32
    %c0_i32_0 = arith.constant 0 : i32
    return %c0_i32, %arg0 : i32, i32
  }
}

module attributes {stable_mosaic.version = 11 : i64} {
  func.func @_pool_fc_head_kernel(%arg0: i32, %arg1: memref<4x8x400xbf16, #tpu.memory_space<vmem>>, %arg2: memref<400x128xbf16, #tpu.memory_space<vmem>>, %arg3: memref<1x128xf32, #tpu.memory_space<vmem>>, %arg4: memref<128x128xbf16, #tpu.memory_space<vmem>>, %arg5: memref<1x128xf32, #tpu.memory_space<vmem>>, %arg6: memref<128x128xbf16, #tpu.memory_space<vmem>>, %arg7: memref<1x128xf32, #tpu.memory_space<vmem>>, %arg8: memref<8x128xf32, #tpu.memory_space<vmem>>) attributes {dimension_semantics = [#tpu.dimension_semantics<arbitrary>], iteration_bounds = array<i64: 1>, scalar_prefetch = 0 : i64, scratch_operands = 0 : i64, tpu.core_type = #tpu.core_type<tc>, window_params = [{pipeline_mode = #tpu.pipeline_mode<synchronous>, transform_indices = @transform_0, window_bounds = array<i64: 4, 8, 400>}, {pipeline_mode = #tpu.pipeline_mode<synchronous>, transform_indices = @transform_1, window_bounds = array<i64: 400, 128>}, {pipeline_mode = #tpu.pipeline_mode<synchronous>, transform_indices = @transform_2, window_bounds = array<i64: 1, 128>}, {pipeline_mode = #tpu.pipeline_mode<synchronous>, transform_indices = @transform_3, window_bounds = array<i64: 128, 128>}, {pipeline_mode = #tpu.pipeline_mode<synchronous>, transform_indices = @transform_4, window_bounds = array<i64: 1, 128>}, {pipeline_mode = #tpu.pipeline_mode<synchronous>, transform_indices = @transform_5, window_bounds = array<i64: 128, 128>}, {pipeline_mode = #tpu.pipeline_mode<synchronous>, transform_indices = @transform_6, window_bounds = array<i64: 1, 128>}, {pipeline_mode = #tpu.pipeline_mode<synchronous>, transform_indices = @transform_7, window_bounds = array<i64: 8, 128>}]} {
    %c0 = arith.constant 0 : index
    %c0_0 = arith.constant 0 : index
    %c0_1 = arith.constant 0 : index
    %0 = vector.load %arg1[%c0, %c0_0, %c0_1] : memref<4x8x400xbf16, #tpu.memory_space<vmem>>, vector<1x8x400xbf16>
    %1 = vector.shape_cast %0 : vector<1x8x400xbf16> to vector<8x400xbf16>
    %c1 = arith.constant 1 : index
    %c0_2 = arith.constant 0 : index
    %c0_3 = arith.constant 0 : index
    %2 = vector.load %arg1[%c1, %c0_2, %c0_3] : memref<4x8x400xbf16, #tpu.memory_space<vmem>>, vector<1x8x400xbf16>
    %3 = vector.shape_cast %2 : vector<1x8x400xbf16> to vector<8x400xbf16>
    %4 = arith.maximumf %1, %3 : vector<8x400xbf16>
    %c2 = arith.constant 2 : index
    %c0_4 = arith.constant 0 : index
    %c0_5 = arith.constant 0 : index
    %5 = vector.load %arg1[%c2, %c0_4, %c0_5] : memref<4x8x400xbf16, #tpu.memory_space<vmem>>, vector<1x8x400xbf16>
    %6 = vector.shape_cast %5 : vector<1x8x400xbf16> to vector<8x400xbf16>
    %c3 = arith.constant 3 : index
    %c0_6 = arith.constant 0 : index
    %c0_7 = arith.constant 0 : index
    %7 = vector.load %arg1[%c3, %c0_6, %c0_7] : memref<4x8x400xbf16, #tpu.memory_space<vmem>>, vector<1x8x400xbf16>
    %8 = vector.shape_cast %7 : vector<1x8x400xbf16> to vector<8x400xbf16>
    %9 = arith.maximumf %6, %8 : vector<8x400xbf16>
    %10 = arith.maximumf %4, %9 : vector<8x400xbf16>
    %c0_8 = arith.constant 0 : index
    %c0_9 = arith.constant 0 : index
    %11 = vector.load %arg2[%c0_8, %c0_9] : memref<400x128xbf16, #tpu.memory_space<vmem>>, vector<400x128xbf16>
    %cst = arith.constant dense<0.000000e+00> : vector<8x128xf32>
    %12 = tpu.matmul %10, %11, %cst {dimension_numbers = #tpu.dot_dimension_numbers<[1], [0], [0], [1], [0, 0, 1, 1], [], []>} : vector<8x400xbf16>, vector<400x128xbf16>, vector<8x128xf32> -> vector<8x128xf32>
    %c0_10 = arith.constant 0 : index
    %c0_11 = arith.constant 0 : index
    %13 = vector.load %arg3[%c0_10, %c0_11] : memref<1x128xf32, #tpu.memory_space<vmem>>, vector<1x128xf32>
    %14 = vector.broadcast %13 : vector<1x128xf32> to vector<8x128xf32>
    %15 = arith.addf %12, %14 : vector<8x128xf32>
    %cst_12 = arith.constant 0.000000e+00 : f32
    %16 = vector.broadcast %cst_12 : f32 to vector<8x128xf32>
    %17 = arith.maximumf %15, %16 : vector<8x128xf32>
    %18 = arith.truncf %17 : vector<8x128xf32> to vector<8x128xbf16>
    %c0_13 = arith.constant 0 : index
    %c0_14 = arith.constant 0 : index
    %19 = vector.load %arg4[%c0_13, %c0_14] : memref<128x128xbf16, #tpu.memory_space<vmem>>, vector<128x128xbf16>
    %cst_15 = arith.constant dense<0.000000e+00> : vector<8x128xf32>
    %20 = tpu.matmul %18, %19, %cst_15 {dimension_numbers = #tpu.dot_dimension_numbers<[1], [0], [0], [1], [0, 0, 1, 1], [], []>} : vector<8x128xbf16>, vector<128x128xbf16>, vector<8x128xf32> -> vector<8x128xf32>
    %c0_16 = arith.constant 0 : index
    %c0_17 = arith.constant 0 : index
    %21 = vector.load %arg5[%c0_16, %c0_17] : memref<1x128xf32, #tpu.memory_space<vmem>>, vector<1x128xf32>
    %22 = vector.broadcast %21 : vector<1x128xf32> to vector<8x128xf32>
    %23 = arith.addf %20, %22 : vector<8x128xf32>
    %cst_18 = arith.constant 0.000000e+00 : f32
    %24 = vector.broadcast %cst_18 : f32 to vector<8x128xf32>
    %25 = arith.maximumf %23, %24 : vector<8x128xf32>
    %26 = arith.truncf %25 : vector<8x128xf32> to vector<8x128xbf16>
    %c0_19 = arith.constant 0 : index
    %c0_20 = arith.constant 0 : index
    %27 = vector.load %arg6[%c0_19, %c0_20] : memref<128x128xbf16, #tpu.memory_space<vmem>>, vector<128x128xbf16>
    %cst_21 = arith.constant dense<0.000000e+00> : vector<8x128xf32>
    %28 = tpu.matmul %26, %27, %cst_21 {dimension_numbers = #tpu.dot_dimension_numbers<[1], [0], [0], [1], [0, 0, 1, 1], [], []>} : vector<8x128xbf16>, vector<128x128xbf16>, vector<8x128xf32> -> vector<8x128xf32>
    %c0_22 = arith.constant 0 : index
    %c0_23 = arith.constant 0 : index
    %29 = vector.load %arg7[%c0_22, %c0_23] : memref<1x128xf32, #tpu.memory_space<vmem>>, vector<1x128xf32>
    %30 = vector.broadcast %29 : vector<1x128xf32> to vector<8x128xf32>
    %31 = arith.addf %28, %30 : vector<8x128xf32>
    %c0_24 = arith.constant 0 : index
    %c0_25 = arith.constant 0 : index
    %32 = vector.load %arg8[%c0_24, %c0_25] : memref<8x128xf32, #tpu.memory_space<vmem>>, vector<8x128xf32>
    tpu.vector_store %arg8[%c0_24, %c0_25], %31 {strides = array<i32>} : memref<8x128xf32, #tpu.memory_space<vmem>>, vector<8x128xf32>,
    return
  }
  func.func @transform_0(%arg0: i32) -> (i32, i32, i32) {
    %c0_i32 = arith.constant 0 : i32
    %c0_i32_0 = arith.constant 0 : i32
    %c0_i32_1 = arith.constant 0 : i32
    %c0_i32_2 = arith.constant 0 : i32
    return %c0_i32, %c0_i32_0, %c0_i32_1 : i32, i32, i32
  }
  func.func @transform_1(%arg0: i32) -> (i32, i32) {
    %c0_i32 = arith.constant 0 : i32
    %c0_i32_0 = arith.constant 0 : i32
    %c0_i32_1 = arith.constant 0 : i32
    return %c0_i32, %c0_i32_0 : i32, i32
  }
  func.func @transform_2(%arg0: i32) -> (i32, i32) {
    %c0_i32 = arith.constant 0 : i32
    %c0_i32_0 = arith.constant 0 : i32
    %c0_i32_1 = arith.constant 0 : i32
    return %c0_i32, %c0_i32_0 : i32, i32
  }
  func.func @transform_3(%arg0: i32) -> (i32, i32) {
    %c0_i32 = arith.constant 0 : i32
    %c0_i32_0 = arith.constant 0 : i32
    %c0_i32_1 = arith.constant 0 : i32
    return %c0_i32, %c0_i32_0 : i32, i32
  }
  func.func @transform_4(%arg0: i32) -> (i32, i32) {
    %c0_i32 = arith.constant 0 : i32
    %c0_i32_0 = arith.constant 0 : i32
    %c0_i32_1 = arith.constant 0 : i32
    return %c0_i32, %c0_i32_0 : i32, i32
  }
  func.func @transform_5(%arg0: i32) -> (i32, i32) {
    %c0_i32 = arith.constant 0 : i32
    %c0_i32_0 = arith.constant 0 : i32
    %c0_i32_1 = arith.constant 0 : i32
    return %c0_i32, %c0_i32_0 : i32, i32
  }
  func.func @transform_6(%arg0: i32) -> (i32, i32) {
    %c0_i32 = arith.constant 0 : i32
    %c0_i32_0 = arith.constant 0 : i32
    %c0_i32_1 = arith.constant 0 : i32
    return %c0_i32, %c0_i32_0 : i32, i32
  }
  func.func @transform_7(%arg0: i32) -> (i32, i32) {
    %c0_i32 = arith.constant 0 : i32
    %c0_i32_0 = arith.constant 0 : i32
    %c0_i32_1 = arith.constant 0 : i32
    return %c0_i32, %c0_i32_0 : i32, i32
  }
}

</mosaic_0001>

<bundles_post_ra>
// kernel: net_forward.3
= control target key start
LH: loop header
LB: loop body
LE: loop exit
PB: predicated region body
PF: predicated region fallthrough
CT: control target
= control target key end

     0   :  { %v994_v1 = vmov 0   ;;  %vm422_vm0 = vcmask 654336   ;;  %v995_v63 = vmov 0.0   ;;  %vm996_vm1 = vmmov 0   ;;  %s1277_s1 = inlined_call_operand.vmem [shape: bf16[80,1664], index: 1, kind: input, shape index: {}]   ;;  %s1278_s0 = inlined_call_operand.vmem [shape: bf16[8,80], index: 0, kind: input, shape index: {}]   ;;  %s1279_s2 = inlined_call_operand.vmem [shape: f32[8,1], index: 2, kind: input, shape index: {}]   ;;  %s1280_s3 = inlined_call_operand.vmem [shape: bf16[8,1664], index: 3, kind: output, shape index: {}]  }
   0x1   :  { %v899_v0 = vld [vmem:[%s1277_s1 + $0x1a4] ss:$52 sps:$4 sm:$0xff]   ;;  %458 = vmatprep.mubr.bf16.mxu0 %v994_v1  ;;  %499 = vmatprep.mubr.bf16.mxu1 %v994_v1  ;;  %v901_v2 = vld [vmem:[%s1277_s1 + $0x1a0] ss:$52 sps:$4 sm:$0xff]   ;;  %v902_v3 = vld [vmem:[%s1277_s1 + $0x13c] ss:$52 sps:$4 sm:$0xff]  }
   0x2   :  { %898 = vset.pattern.permute.xlu0 %v994_v1  ;;  %432 = vmatprep.subr.bf16.mxu0 %v899_v0  ;;  %v904_v4 = vld [vmem:[%s1277_s1 + $0x138] ss:$52 sps:$4 sm:$0xff]   ;;  %v905_v5 = vld [vmem:[%s1277_s1 + $0xd4] ss:$52 sps:$4 sm:$0xff]   ;;  %v907_v8 = vld [vmem:[%s1277_s1 + $0xd0] ss:$52 sps:$4 sm:$0xff]  }
   0x3   :  { %433 = vmatpush1.bf16.msra.mxu0 %v901_v2  ;;  %v910_v6 = vld [vmem:[%s1277_s1 + $0x1ac] ss:$52 sps:$4 sm:$0xff]   ;;  %v913_v7 = vld [vmem:[%s1277_s1 + $0x1a8] ss:$52 sps:$4 sm:$0xff]   ;;  %v916_v10 = vld [vmem:[%s1277_s1 + $0x144] ss:$52 sps:$4 sm:$0xff]  }
   0x4   :  { %434 = vmatprep.subr.bf16.mxu0 %v902_v3  ;;  %473 = vmatprep.subr.bf16.mxu1 %v910_v6  ;;  %v908_v9 = vld [vmem:[%s1277_s1 + $0x6c] ss:$52 sps:$4 sm:$0xff]   ;;  %v920_v12 = vld [vmem:[%s1277_s1 + $0xdc] ss:$52 sps:$4 sm:$0xff]   ;;  %v914_v14 = vld [vmem:[%s1277_s1 + $0x4] ss:$52 sps:$4 sm:$0xff]  }
   0x5   :  { %474 = vmatpush1.bf16.msra.mxu1 %v913_v7  ;;  %v919_v11 = vld [vmem:[%s1277_s1 + $0x140] ss:$52 sps:$4 sm:$0xff]   ;;  %v912_v13 = vld [vmem:[%s1277_s1 + $0x68] ss:$52 sps:$4 sm:$0xff]   ;;  %v925_v15 = vld [vmem:[%s1277_s1 + $0xd8] ss:$52 sps:$4 sm:$0xff]  }
   0x6   :  { %475 = vmatprep.subr.bf16.mxu1 %v916_v10  ;;  %v926_v16 = vld [vmem:[%s1277_s1 + $0x74] ss:$52 sps:$4 sm:$0xff]   ;;  %v931_v19 = vld [vmem:[%s1277_s1 + $0x70] ss:$52 sps:$4 sm:$0xff]   ;;  %v932_v20 = vld [vmem:[%s1277_s1 + $0xc] ss:$52 sps:$4 sm:$0xff]  }
   0x7   :  { %435 = vmatpush1.bf16.msra.mxu0 %v904_v4  ;;  %v918_v17 = vld [vmem:[%s1277_s1] ss:$52 sps:$4 sm:$0xff]   ;;  %v922_v22 = vld [vmem:[%s1277_s1 + $0x1b0] ss:$52 sps:$4 sm:$0xff]   ;;  %v937_v24 = vld [vmem:[%s1277_s1 + $0x8] ss:$52 sps:$4 sm:$0xff]  }
   0x8   :  { %436 = vmatprep.subr.bf16.mxu0 %v905_v5  ;;  %v924_v18 = vld [vmem:[%s1277_s1 + $0x1b4] ss:$52 sps:$4 sm:$0xff]   ;;  %v1083_v21 = vld [vmem:[%s1278_s0] sm:$0xf]  ;;  %v943_v25 = vld [vmem:[%s1277_s1 + $0x1bc] ss:$52 sps:$4 sm:$0xff]  }
   0x9   :  { %476 = vmatpush1.bf16.msra.mxu1 %v919_v11  ;;  %v930_v23 = vld [vmem:[%s1277_s1 + $0x14c] ss:$52 sps:$4 sm:$0xff]   ;;  %v928_v26 = vld [vmem:[%s1277_s1 + $0x148] ss:$52 sps:$4 sm:$0xff]   ;;  %v936_v27 = vld [vmem:[%s1277_s1 + $0xe4] ss:$52 sps:$4 sm:$0xff]  }
   0xa   :  { %477 = vmatprep.subr.bf16.mxu1 %v920_v12  ;;  %v941_v28 = vld [vmem:[%s1277_s1 + $0x1b8] ss:$52 sps:$4 sm:$0xff]   ;;  %v949_v29 = vld [vmem:[%s1277_s1 + $0x154] ss:$52 sps:$4 sm:$0xff]   ;;  %v940_v31 = vld [vmem:[%s1277_s1 + $0x7c] ss:$52 sps:$4 sm:$0xff]  }
   0xb   :  { %437 = vmatpush1.bf16.msra.mxu0 %v907_v8  ;;  %v934_v30 = vld [vmem:[%s1277_s1 + $0xe0] ss:$52 sps:$4 sm:$0xff]   ;;  %v947_v32 = vld [vmem:[%s1277_s1 + $0x150] ss:$52 sps:$4 sm:$0xff]   ;;  %v938_v34 = vld [vmem:[%s1277_s1 + $0x78] ss:$52 sps:$4 sm:$0xff]  }
   0xc   :  { %438 = vmatprep.subr.bf16.mxu0 %v908_v9  ;;  %v952_v33 = vld [vmem:[%s1277_s1 + $0xec] ss:$52 sps:$4 sm:$0xff]   ;;  %v946_v35 = vld [vmem:[%s1277_s1 + $0x14] ss:$52 sps:$4 sm:$0xff]   ;;  %v958_v37 = vld [vmem:[%s1277_s1 + $0x84] ss:$52 sps:$4 sm:$0xff]  }
   0xd   :  { %478 = vmatpush1.bf16.msra.mxu1 %v925_v15  ;;  %v950_v36 = vld [vmem:[%s1277_s1 + $0xe8] ss:$52 sps:$4 sm:$0xff]   ;;  %v944_v38 = vld [vmem:[%s1277_s1 + $0x10] ss:$52 sps:$4 sm:$0xff]   ;;  %v956_v40 = vld [vmem:[%s1277_s1 + $0x80] ss:$52 sps:$4 sm:$0xff]  }
   0xe   :  { %479 = vmatprep.subr.bf16.mxu1 %v926_v16  ;;  %v955_v39 = vld [vmem:[%s1277_s1 + $0x1c4] ss:$52 sps:$4 sm:$0xff]   ;;  %v964_v41 = vld [vmem:[%s1277_s1 + $0x1c] ss:$52 sps:$4 sm:$0xff]   ;;  %v953_v42 = vld [vmem:[%s1277_s1 + $0x1c0] ss:$52 sps:$4 sm:$0xff]  }
   0xf   :  { %439 = vmatpush1.bf16.msra.mxu0 %v912_v13  ;;  %v961_v43 = vld [vmem:[%s1277_s1 + $0x15c] ss:$52 sps:$4 sm:$0xff]   ;;  %v962_v44 = vld [vmem:[%s1277_s1 + $0x18] ss:$52 sps:$4 sm:$0xff]   ;;  %v967_v47 = vld [vmem:[%s1277_s1 + $0xf4] ss:$52 sps:$4 sm:$0xff]  }
  0x10   :  { %440 = vmatprep.subr.bf16.mxu0 %v914_v14  ;;  %v973_v45 = vld [vmem:[%s1277_s1 + $0x1cc] ss:$52 sps:$4 sm:$0xff]   ;;  %v971_v48 = vld [vmem:[%s1277_s1 + $0x1c8] ss:$52 sps:$4 sm:$0xff]   ;;  %v979_v49 = vld [vmem:[%s1277_s1 + $0x164] ss:$52 sps:$4 sm:$0xff]  }
  0x11   :  { %480 = vmatpush1.bf16.msra.mxu1 %v931_v19  ;;  %v959_v46 = vld [vmem:[%s1277_s1 + $0x158] ss:$52 sps:$4 sm:$0xff]   ;;  %v86_v50 = vld [vmem:[%s1279_s2] sm:$0xff]  ;;  %v982_v54 = vld [vmem:[%s1277_s1 + $0xfc] ss:$52 sps:$4 sm:$0xff]  }
  0x12   :  { %481 = vmatprep.subr.bf16.mxu1 %v932_v20  ;;  %89 = vperm.xlu0 %898, %v86_v50   ;;  %v965_v51 = vld [vmem:[%s1277_s1 + $0xf0] ss:$52 sps:$4 sm:$0xff]   ;;  %v970_v52 = vld [vmem:[%s1277_s1 + $0x8c] ss:$52 sps:$4 sm:$0xff]   ;;  %v968_v55 = vld [vmem:[%s1277_s1 + $0x88] ss:$52 sps:$4 sm:$0xff]  }
  0x13   :  { %441 = vmatpush1.bf16.msra.mxu0 %v918_v17  ;;  %v977_v53 = vld [vmem:[%s1277_s1 + $0x160] ss:$52 sps:$4 sm:$0xff]   ;;  %v976_v56 = vld [vmem:[%s1277_s1 + $0x24] ss:$52 sps:$4 sm:$0xff]   ;;  %v988_v0 = vld [vmem:[%s1277_s1 + $0x28] ss:$52 sps:$4 sm:$0xff]  }
  0x14   :  { %514 = vmatprep.subr.bf16.mxu0 %v924_v18  ;;  %v980_v57 = vld [vmem:[%s1277_s1 + $0xf8] ss:$52 sps:$4 sm:$0xff]   ;;  %v986_v58 = vld [vmem:[%s1277_s1 + $0x94] ss:$52 sps:$4 sm:$0xff]   ;;  %v984_v60 = vld [vmem:[%s1277_s1 + $0x90] ss:$52 sps:$4 sm:$0xff]  }
  0x15   :  { %482 = vmatpush1.bf16.msra.mxu1 %v937_v24  ;;  %v974_v59 = vld [vmem:[%s1277_s1 + $0x20] ss:$52 sps:$4 sm:$0xff]   ;;  %v983_v62 = vld [vmem:[%s1277_s1 + $0x1d0] ss:$52 sps:$4 sm:$0xff]   ;;  %v992_v3 = vld [vmem:[%s1277_s1 + $0x98] ss:$52 sps:$4 sm:$0xff]  }
  0x16   :  { %854 = vmatmul.mubr.msk.bf16.vlgmr.msra.gmra.mxu0 %vm422_vm0, %v1083_v21  ;;  %555 = vmatprep.subr.bf16.mxu1 %v943_v25  ;;  %v990_v61 = vld [vmem:[%s1277_s1 + $0x2c] ss:$52 sps:$4 sm:$0xff]   ;;  %v993_v4 = vld [vmem:[%s1277_s1 + $0x30] ss:$52 sps:$4 sm:$0xff]  }
  0x17   :  { %515 = vmatpush1.bf16.msra.mxu0 %v922_v22  ;;  %540 = vmatprep.mubr.bf16.mxu0 %v994_v1  ;;  %v991_v2 = vld [vmem:[%s1277_s1 + $0x100] ss:$52 sps:$4 sm:$0xff]  }
  0x18   :  { %516 = vmatprep.subr.bf16.mxu0 %v930_v23  ;;  %855 = vmatmul.mubr.msk.bf16.vlgmr.msra.gmra.mxu1 %vm422_vm0, %v1083_v21 }
  0x19   :  { %556 = vmatpush1.bf16.msra.mxu1 %v941_v28  ;;  %581 = vmatprep.mubr.bf16.mxu1 %v994_v1 }
  0x1a   :  { %557 = vmatprep.subr.bf16.mxu1 %v949_v29 }
  0x1b   :  { %517 = vmatpush1.bf16.msra.mxu0 %v928_v26 }
  0x1c   :  { %518 = vmatprep.subr.bf16.mxu0 %v936_v27 }
  0x1d   :  { %558 = vmatpush1.bf16.msra.mxu1 %v947_v32 }
  0x1e   :  { %559 = vmatprep.subr.bf16.mxu1 %v952_v33 }
  0x1f   :  { %519 = vmatpush1.bf16.msra.mxu0 %v934_v30 }
  0x20   :  { %520 = vmatprep.subr.bf16.mxu0 %v940_v31 }
  0x21   :  { %560 = vmatpush1.bf16.msra.mxu1 %v950_v36 }
  0x22   :  { %561 = vmatprep.subr.bf16.mxu1 %v958_v37 }
  0x23   :  { %521 = vmatpush1.bf16.msra.mxu0 %v938_v34 }
  0x24   :  { %522 = vmatprep.subr.bf16.mxu0 %v946_v35 }
  0x25   :  { %562 = vmatpush1.bf16.msra.mxu1 %v956_v40 }
  0x26   :  { %563 = vmatprep.subr.bf16.mxu1 %v964_v41 }
  0x27   :  { %523 = vmatpush1.bf16.msra.mxu0 %v944_v38 }
  0x28   :  { %596 = vmatprep.subr.bf16.mxu0 %v955_v39 }
  0x29   :  { %564 = vmatpush1.bf16.msra.mxu1 %v962_v44 }
  0x2a   :  { %856 = vmatmul.mubr.msk.bf16.vlgmr.msra.gmra.mxu0 %vm422_vm0, %v1083_v21  ;;  %637 = vmatprep.subr.bf16.mxu1 %v973_v45 }
  0x2b   :  { %597 = vmatpush1.bf16.msra.mxu0 %v953_v42  ;;  %622 = vmatprep.mubr.bf16.mxu0 %v994_v1 }
  0x2c   :  { %598 = vmatprep.subr.bf16.mxu0 %v961_v43  ;;  %857 = vmatmul.mubr.msk.bf16.vlgmr.msra.gmra.mxu1 %vm422_vm0, %v1083_v21 }
  0x2d   :  { %638 = vmatpush1.bf16.msra.mxu1 %v971_v48  ;;  %663 = vmatprep.mubr.bf16.mxu1 %v994_v1  ;;  %v987_v1 = vld [vmem:[%s1277_s1 + $0x168] ss:$52 sps:$4 sm:$0xff]  }
  0x2e   :  { %639 = vmatprep.subr.bf16.mxu1 %v979_v49 }
  0x2f   :  { %599 = vmatpush1.bf16.msra.mxu0 %v959_v46 }
  0x30   :  { %600 = vmatprep.subr.bf16.mxu0 %v967_v47 }
  0x31   :  { %640 = vmatpush1.bf16.msra.mxu1 %v977_v53 }
  0x32   :  { %641 = vmatprep.subr.bf16.mxu1 %v982_v54 }
  0x33   :  { %601 = vmatpush1.bf16.msra.mxu0 %v965_v51 }
  0x34   :  { %602 = vmatprep.subr.bf16.mxu0 %v970_v52 }
  0x35   :  { %642 = vmatpush1.bf16.msra.mxu1 %v980_v57 }
  0x36   :  { %643 = vmatprep.subr.bf16.mxu1 %v986_v58 }
  0x37   :  { %603 = vmatpush1.bf16.msra.mxu0 %v968_v55 }
  0x38   :  { %604 = vmatprep.subr.bf16.mxu0 %v976_v56 }
  0x39   :  { %644 = vmatpush1.bf16.msra.mxu1 %v984_v60 }
  0x3a   :  { %645 = vmatprep.subr.bf16.mxu1 %v990_v61 }
  0x3b   :  { %605 = vmatpush1.bf16.msra.mxu0 %v974_v59 }
  0x3c   :  { %881 = vmatprep.subr.bf16.mxu0 %v995_v63 }
  0x3d   :  { %646 = vmatpush1.bf16.msra.mxu1 %v988_v0 }
  0x3e   :  { %858 = vmatmul.mubr.msk.bf16.vlgmr.msra.gmra.mxu0 %vm422_vm0, %v1083_v21 }
  0x3f   :  { %882 = vmatpush3.bf16.msra.mxu0 %v983_v62  ;;  %891 = vmatprep.mubr.msk.bf16.mxu0 %vm996_vm1, %v995_v63 }
  0x40   :  { %883 = vmatprep.subr.bf16.mxu0 %v995_v63  ;;  %859 = vmatmul.mubr.msk.bf16.vlgmr.msra.gmra.mxu1 %vm422_vm0, %v1083_v21 }
  0x43   :  { %884 = vmatpush3.bf16.msra.mxu0 %v987_v1 }
  0x44   :  { %885 = vmatprep.subr.bf16.mxu0 %v995_v63 }
  0x47   :  { %886 = vmatpush3.bf16.msra.mxu0 %v991_v2 }
  0x48   :  { %887 = vmatprep.subr.bf16.mxu0 %v995_v63 }
  0x4b   :  { %888 = vmatpush3.bf16.msra.mxu0 %v992_v3 }
  0x4c   :  { %889 = vmatprep.subr.bf16.mxu0 %v995_v63 }
  0x4f   :  { %890 = vmatpush3.bf16.msra.mxu0 %v993_v4 }
  0x52   :  { %892 = vmatmul.mubr.msk.bf16.vlgmr.msra.gmra.mxu0 %vm422_vm0, %v1083_v21 }
  0x8d   :  { %v1241_v5 = vpop.permute.xlu0 %89 }
  0xd6   :  { %v460_v6 = vpop.f32.mrf.mxu0 }
  0xd7   :  { %v461_v7 = vadd.f32 %v460_v6, %v1241_v5 }
  0xd8   :  { %v462_v8 = vpop.f32.mrf.mxu0  ;;  %v501_v13 = vpop.f32.mrf.mxu1 }
  0xd9   :  { %v463_v9 = vadd.f32 %v462_v8, %v1241_v5  ;;  %v712_v10 = vmax.f32 %v461_v7, 0.0  ;;  %v502_v15 = vadd.f32 %v501_v13, %v1241_v5 }
  0xda   :  { %v464_v11 = vpop.f32.mrf.mxu0  ;;  %v503_v17 = vpop.f32.mrf.mxu1 }
  0xdb   :  { %v713_v12 = vmax.f32 %v463_v9, 0.0  ;;  %v714_v18 = vmax.f32 %v502_v15, 0.0  ;;  %v504_v19 = vadd.f32 %v503_v17, %v1241_v5 }
  0xdc   :  { %v465_v14 = vpop.f32.mrf.mxu0  ;;  %v505_v20 = vpop.f32.mrf.mxu1 }
  0xdd   :  { %v868_v16 = vpack.c.bf16 %v713_v12, %v712_v10  ;;  %v715_v21 = vmax.f32 %v504_v19, 0.0 }
  0xde   :  { %v506_v22 = vpop.f32.mrf.mxu1 }
  0xdf   :  { %778 = vst [vmem:[%s1280_s3] sm:$0xff] %v868_v16  ;;  %v869_v23 = vpack.c.bf16 %v715_v21, %v714_v18 }
  0xe1   :  { %779 = vst [vmem:[%s1280_s3 + $0x8] sm:$0xff] %v869_v23 }
  0xea   :  { %v542_v24 = vpop.f32.mrf.mxu0 }
  0xeb   :  { %v543_v25 = vadd.f32 %v542_v24, %v1241_v5 }
  0xec   :  { %v544_v26 = vpop.f32.mrf.mxu0  ;;  %v583_v31 = vpop.f32.mrf.mxu1 }
  0xed   :  { %v716_v27 = vmax.f32 %v543_v25, 0.0  ;;  %v545_v28 = vadd.f32 %v544_v26, %v1241_v5  ;;  %v584_v33 = vadd.f32 %v583_v31, %v1241_v5 }
  0xee   :  { %v546_v29 = vpop.f32.mrf.mxu0  ;;  %v585_v35 = vpop.f32.mrf.mxu1 }
  0xef   :  { %v717_v30 = vmax.f32 %v545_v28, 0.0  ;;  %v718_v36 = vmax.f32 %v584_v33, 0.0  ;;  %v586_v37 = vadd.f32 %v585_v35, %v1241_v5 }
  0xf0   :  { %v547_v32 = vpop.f32.mrf.mxu0  ;;  %v587_v38 = vpop.f32.mrf.mxu1 }
  0xf1   :  { %v870_v34 = vpack.c.bf16 %v717_v30, %v716_v27  ;;  %v719_v39 = vmax.f32 %v586_v37, 0.0 }
  0xf2   :  { %v588_v40 = vpop.f32.mrf.mxu1 }
  0xf3   :  { %780 = vst [vmem:[%s1280_s3 + $0x10] sm:$0xff] %v870_v34  ;;  %v871_v41 = vpack.c.bf16 %v719_v39, %v718_v36 }
  0xf5   :  { %781 = vst [vmem:[%s1280_s3 + $0x18] sm:$0xff] %v871_v41 }
  0xfe   :  { %v624_v42 = vpop.f32.mrf.mxu0 }
  0xff   :  { %v625_v43 = vadd.f32 %v624_v42, %v1241_v5 }
 0x100   :  { %v626_v44 = vpop.f32.mrf.mxu0  ;;  %v665_v49 = vpop.f32.mrf.mxu1 }
 0x101   :  { %v720_v45 = vmax.f32 %v625_v43, 0.0  ;;  %v627_v46 = vadd.f32 %v626_v44, %v1241_v5  ;;  %v666_v51 = vadd.f32 %v665_v49, %v1241_v5 }
 0x102   :  { %v628_v47 = vpop.f32.mrf.mxu0  ;;  %v667_v53 = vpop.f32.mrf.mxu1 }
 0x103   :  { %v721_v48 = vmax.f32 %v627_v46, 0.0  ;;  %v722_v54 = vmax.f32 %v666_v51, 0.0  ;;  %v668_v55 = vadd.f32 %v667_v53, %v1241_v5 }
 0x104   :  { %v629_v50 = vpop.f32.mrf.mxu0  ;;  %v669_v56 = vpop.f32.mrf.mxu1 }
 0x105   :  { %v872_v52 = vpack.c.bf16 %v721_v48, %v720_v45  ;;  %v723_v57 = vmax.f32 %v668_v55, 0.0 }
 0x106   :  { %v670_v58 = vpop.f32.mrf.mxu1 }
 0x107   :  { %782 = vst [vmem:[%s1280_s3 + $0x20] sm:$0xff] %v872_v52  ;;  %v873_v59 = vpack.c.bf16 %v723_v57, %v722_v54 }
 0x109   :  { %783 = vst [vmem:[%s1280_s3 + $0x28] sm:$0xff] %v873_v59 }
 0x112   :  { %v706_v60 = vpop.f32.mrf.mxu0 }
 0x113   :  { %v707_v61 = vadd.f32 %v706_v60, %v1241_v5 }
 0x114   :  { %v893_v62 = vpop.f32.mrf.mxu0 }
 0x115   :  { %v724_v63 = vmax.f32 %v707_v61, 0.0 }
 0x116   :  { %v709_v0 = vpop.f32.mrf.mxu0 }
 0x117   :  { %v874_v1 = vpack.c.bf16 %v724_v63, %v724_v63 }
 0x118   :  { %v894_v2 = vpop.f32.mrf.mxu0 }
 0x119   :  { %784 = vst [vmem:[%s1280_s3 + $0x30] sm:$0xf] %v874_v1 }

// kernel: net_forward.4
= control target key start
LH: loop header
LB: loop body
LE: loop exit
PB: predicated region body
PF: predicated region fallthrough
CT: control target
= control target key end

     0   :  { %v388_v3 = vmov 0   ;;  %vm287_vm0 = vcmask 261120   ;;  %s683_s1 = inlined_call_operand.vmem [shape: bf16[160,256], index: 1, kind: input, shape index: {}]   ;;  %s684_s2 = inlined_call_operand.vmem [shape: bf16[160,256], index: 2, kind: input, shape index: {}]   ;;  %s685_s3 = inlined_call_operand.vmem [shape: bf16[160,256], index: 3, kind: input, shape index: {}]   ;;  %s686_s4 = inlined_call_operand.vmem [shape: bf16[160,256], index: 4, kind: input, shape index: {}]   ;;  %s687_s0 = inlined_call_operand.vmem [shape: bf16[16,160], index: 0, kind: input, shape index: {}]   ;;  %s688_s5 = inlined_call_operand.vmem [shape: f32[16,1], index: 5, kind: input, shape index: {}]   ;;  %s689_s6 = inlined_call_operand.vmem [shape: bf16[16,256], index: 6, kind: output, shape index: {}]  }
   0x1   :  { %v38_v0 = vld [vmem:[%s683_s1 + $0x70] sm:$0xff]  ;;  %v39_v1 = vld [vmem:[%s683_s1 + $0x78] sm:$0xff]  ;;  %384 = vset.pattern.permute.xlu0 %v388_v3  ;;  %v36_v11 = vld [vmem:[%s683_s1 + $0x60] sm:$0xff] }
   0x2   :  { %v58_v2 = vld [vmem:[%s684_s2 + $0x70] sm:$0xff]  ;;  %v59_v4 = vld [vmem:[%s684_s2 + $0x78] sm:$0xff]  ;;  %v37_v14 = vld [vmem:[%s683_s1 + $0x68] sm:$0xff] }
   0x3   :  { %v78_v5 = vmax.bf16 %v58_v2, %v38_v0  ;;  %v98_v6 = vld [vmem:[%s685_s3 + $0x70] sm:$0xff]  ;;  %v99_v7 = vld [vmem:[%s685_s3 + $0x78] sm:$0xff]  ;;  %v79_v8 = vmax.bf16 %v59_v4, %v39_v1  ;;  %v56_v15 = vld [vmem:[%s684_s2 + $0x60] sm:$0xff] }
   0x4   :  { %v118_v9 = vld [vmem:[%s686_s4 + $0x70] sm:$0xff]  ;;  %v119_v10 = vld [vmem:[%s686_s4 + $0x78] sm:$0xff]  ;;  %v57_v16 = vld [vmem:[%s684_s2 + $0x68] sm:$0xff]  ;;  %v76_v17 = vmax.bf16 %v56_v15, %v36_v11 }
   0x5   :  { %v138_v12 = vmax.bf16 %v118_v9, %v98_v6  ;;  %v139_v13 = vmax.bf16 %v119_v10, %v99_v7  ;;  %v77_v18 = vmax.bf16 %v57_v16, %v37_v14  ;;  %v96_v19 = vld [vmem:[%s685_s3 + $0x60] sm:$0xff]  ;;  %v97_v20 = vld [vmem:[%s685_s3 + $0x68] sm:$0xff]  ;;  %v34_v26 = vld [vmem:[%s683_s1 + $0x50] sm:$0xff] }
   0x6   :  { %v116_v21 = vld [vmem:[%s686_s4 + $0x60] sm:$0xff]  ;;  %v117_v24 = vld [vmem:[%s686_s4 + $0x68] sm:$0xff]  ;;  %v35_v27 = vld [vmem:[%s683_s1 + $0x58] sm:$0xff] }
   0x7   :  { %v158_v22 = vmax.bf16 %v138_v12, %v78_v5  ;;  %v159_v23 = vmax.bf16 %v139_v13, %v79_v8  ;;  %v136_v25 = vmax.bf16 %v116_v21, %v96_v19  ;;  %v137_v28 = vmax.bf16 %v117_v24, %v97_v20  ;;  %v54_v29 = vld [vmem:[%s684_s2 + $0x50] sm:$0xff]  ;;  %v55_v30 = vld [vmem:[%s684_s2 + $0x58] sm:$0xff]  ;;  %v32_v43 = vld [vmem:[%s683_s1 + $0x40] sm:$0xff] }
   0x8   :  { %v94_v31 = vld [vmem:[%s685_s3 + $0x50] sm:$0xff]  ;;  %v74_v35 = vmax.bf16 %v54_v29, %v34_v26  ;;  %v95_v36 = vld [vmem:[%s685_s3 + $0x58] sm:$0xff]  ;;  %v75_v40 = vmax.bf16 %v55_v30, %v35_v27  ;;  %v33_v44 = vld [vmem:[%s683_s1 + $0x48] sm:$0xff] }
   0x9   :  { %v373_v32 = vcombine.high %v158_v22, %v159_v23  ;;  %v372_v33 = vcombine.low %v158_v22, %v159_v23  ;;  %v156_v34 = vmax.bf16 %v136_v25, %v76_v17  ;;  %v114_v37 = vld [vmem:[%s686_s4 + $0x50] sm:$0xff]  ;;  %v115_v38 = vld [vmem:[%s686_s4 + $0x58] sm:$0xff]  ;;  %v157_v39 = vmax.bf16 %v137_v28, %v77_v18  ;;  %v52_v45 = vld [vmem:[%s684_s2 + $0x40] sm:$0xff] }
   0xa   :  { %v134_v41 = vmax.bf16 %v114_v37, %v94_v31  ;;  %v135_v42 = vmax.bf16 %v115_v38, %v95_v36  ;;  %v53_v46 = vld [vmem:[%s684_s2 + $0x48] sm:$0xff]  ;;  %v72_v47 = vmax.bf16 %v52_v45, %v32_v43  ;;  %v92_v48 = vld [vmem:[%s685_s3 + $0x40] sm:$0xff]  ;;  %v30_v56 = vld [vmem:[%s683_s1 + $0x30] sm:$0xff] }
   0xb   :  { %291 = vmatprep.subr.bf16.mxu0 %v373_v32  ;;  %v93_v49 = vld [vmem:[%s685_s3 + $0x48] sm:$0xff]  ;;  %v371_v50 = vcombine.high %v156_v34, %v157_v39  ;;  %v370_v51 = vcombine.low %v156_v34, %v157_v39  ;;  %v112_v54 = vld [vmem:[%s686_s4 + $0x40] sm:$0xff]  ;;  %v73_v57 = vmax.bf16 %v53_v46, %v33_v44  ;;  %v31_v60 = vld [vmem:[%s683_s1 + $0x38] sm:$0xff] }
   0xc   :  { %292 = vmatpush1.bf16.msra.mxu0 %v372_v33  ;;  %v154_v52 = vmax.bf16 %v134_v41, %v74_v35  ;;  %v155_v53 = vmax.bf16 %v135_v42, %v75_v40  ;;  %v113_v55 = vld [vmem:[%s686_s4 + $0x48] sm:$0xff]  ;;  %v132_v58 = vmax.bf16 %v112_v54, %v92_v48  ;;  %v50_v61 = vld [vmem:[%s684_s2 + $0x30] sm:$0xff]  ;;  %v51_v62 = vld [vmem:[%s684_s2 + $0x38] sm:$0xff] }
   0xd   :  { %v133_v59 = vmax.bf16 %v113_v55, %v93_v49  ;;  %293 = vmatprep.subr.bf16.mxu0 %v371_v50  ;;  %v70_v0 = vmax.bf16 %v50_v61, %v30_v56  ;;  %v71_v1 = vmax.bf16 %v51_v62, %v31_v60  ;;  %v90_v2 = vld [vmem:[%s685_s3 + $0x30] sm:$0xff]  ;;  %v91_v3 = vld [vmem:[%s685_s3 + $0x38] sm:$0xff]  ;;  %v28_v9 = vld [vmem:[%s683_s1 + $0x20] sm:$0xff] }
   0xe   :  { %v369_v63 = vcombine.high %v154_v52, %v155_v53  ;;  %v110_v4 = vld [vmem:[%s686_s4 + $0x30] sm:$0xff]  ;;  %v152_v5 = vmax.bf16 %v132_v58, %v72_v47  ;;  %v111_v7 = vld [vmem:[%s686_s4 + $0x38] sm:$0xff]  ;;  %v29_v10 = vld [vmem:[%s683_s1 + $0x28] sm:$0xff]  ;;  %v368_v11 = vcombine.low %v154_v52, %v155_v53 }
   0xf   :  { %v153_v6 = vmax.bf16 %v133_v59, %v73_v57  ;;  %v130_v8 = vmax.bf16 %v110_v4, %v90_v2  ;;  %v131_v12 = vmax.bf16 %v111_v7, %v91_v3  ;;  %v48_v13 = vld [vmem:[%s684_s2 + $0x20] sm:$0xff]  ;;  %v49_v14 = vld [vmem:[%s684_s2 + $0x28] sm:$0xff]  ;;  %v26_v26 = vld [vmem:[%s683_s1 + $0x10] sm:$0xff] }
  0x10   :  { %294 = vmatpush1.bf16.msra.mxu0 %v370_v51  ;;  %v88_v15 = vld [vmem:[%s685_s3 + $0x20] sm:$0xff]  ;;  %v68_v18 = vmax.bf16 %v48_v13, %v28_v9  ;;  %v89_v19 = vld [vmem:[%s685_s3 + $0x28] sm:$0xff]  ;;  %v69_v23 = vmax.bf16 %v49_v14, %v29_v10  ;;  %v27_v27 = vld [vmem:[%s683_s1 + $0x18] sm:$0xff] }
  0x11   :  { %295 = vmatprep.subr.bf16.mxu0 %v369_v63  ;;  %v367_v16 = vcombine.high %v152_v5, %v153_v6  ;;  %v150_v17 = vmax.bf16 %v130_v8, %v70_v0  ;;  %v108_v20 = vld [vmem:[%s686_s4 + $0x20] sm:$0xff]  ;;  %v109_v21 = vld [vmem:[%s686_s4 + $0x28] sm:$0xff]  ;;  %v151_v22 = vmax.bf16 %v131_v12, %v71_v1  ;;  %v46_v28 = vld [vmem:[%s684_s2 + $0x10] sm:$0xff]  ;;  %v366_v32 = vcombine.low %v152_v5, %v153_v6 }
  0x12   :  { %v128_v24 = vmax.bf16 %v108_v20, %v88_v15  ;;  %v129_v25 = vmax.bf16 %v109_v21, %v89_v19  ;;  %v47_v29 = vld [vmem:[%s684_s2 + $0x18] sm:$0xff]  ;;  %v86_v30 = vld [vmem:[%s685_s3 + $0x10] sm:$0xff]  ;;  %v66_v35 = vmax.bf16 %v46_v28, %v26_v26  ;;  %v24_v38 = vld [vmem:[%s683_s1] sm:$0xff] }
  0x13   :  { %v87_v31 = vld [vmem:[%s685_s3 + $0x18] sm:$0xff]  ;;  %v365_v33 = vcombine.high %v150_v17, %v151_v22  ;;  %v106_v36 = vld [vmem:[%s686_s4 + $0x10] sm:$0xff]  ;;  %v67_v40 = vmax.bf16 %v47_v29, %v27_v27  ;;  %v25_v43 = vld [vmem:[%s683_s1 + $0x8] sm:$0xff]  ;;  %v364_v49 = vcombine.low %v150_v17, %v151_v22 }
  0x14   :  { %296 = vmatpush1.bf16.msra.mxu0 %v368_v11  ;;  %v148_v34 = vmax.bf16 %v128_v24, %v68_v18  ;;  %v107_v37 = vld [vmem:[%s686_s4 + $0x18] sm:$0xff]  ;;  %v149_v39 = vmax.bf16 %v129_v25, %v69_v23  ;;  %v126_v41 = vmax.bf16 %v106_v36, %v86_v30  ;;  %v44_v44 = vld [vmem:[%s684_s2] sm:$0xff]  ;;  %v45_v45 = vld [vmem:[%s684_s2 + $0x8] sm:$0xff] }
  0x15   :  { %297 = vmatprep.subr.bf16.mxu0 %v367_v16  ;;  %v127_v42 = vmax.bf16 %v107_v37, %v87_v31  ;;  %v84_v46 = vld [vmem:[%s685_s3] sm:$0xff]  ;;  %v85_v47 = vld [vmem:[%s685_s3 + $0x8] sm:$0xff]  ;;  %v64_v51 = vmax.bf16 %v44_v44, %v24_v38  ;;  %v65_v52 = vmax.bf16 %v45_v45, %v25_v43  ;;  %v42_v55 = vld [vmem:[%s683_s1 + $0x90] sm:$0xff] }
  0x16   :  { %v104_v48 = vld [vmem:[%s686_s4] sm:$0xff]  ;;  %v105_v50 = vld [vmem:[%s686_s4 + $0x8] sm:$0xff]  ;;  %v43_v56 = vld [vmem:[%s683_s1 + $0x98] sm:$0xff]  ;;  %v363_v57 = vcombine.high %v148_v34, %v149_v39  ;;  %v146_v58 = vmax.bf16 %v126_v41, %v66_v35  ;;  %v362_v2 = vcombine.low %v148_v34, %v149_v39 }
  0x17   :  { %v124_v53 = vmax.bf16 %v104_v48, %v84_v46  ;;  %v125_v54 = vmax.bf16 %v105_v50, %v85_v47  ;;  %v147_v59 = vmax.bf16 %v127_v42, %v67_v40  ;;  %v62_v60 = vld [vmem:[%s684_s2 + $0x90] sm:$0xff]  ;;  %v63_v63 = vld [vmem:[%s684_s2 + $0x98] sm:$0xff]  ;;  %v40_v3 = vld [vmem:[%s683_s1 + $0x80] sm:$0xff] }
  0x18   :  { %298 = vmatpush1.bf16.msra.mxu0 %v366_v32  ;;  %v102_v61 = vld [vmem:[%s685_s3 + $0x90] sm:$0xff]  ;;  %v103_v0 = vld [vmem:[%s685_s3 + $0x98] sm:$0xff]  ;;  %v60_v4 = vld [vmem:[%s684_s2 + $0x80] sm:$0xff]  ;;  %v82_v7 = vmax.bf16 %v62_v60, %v42_v55  ;;  %v83_v13 = vmax.bf16 %v63_v63, %v43_v56 }
  0x19   :  { %299 = vmatprep.subr.bf16.mxu0 %v365_v33  ;;  %v122_v62 = vld [vmem:[%s686_s4 + $0x90] sm:$0xff]  ;;  %v123_v1 = vld [vmem:[%s686_s4 + $0x98] sm:$0xff]  ;;  %v144_v5 = vmax.bf16 %v124_v53, %v64_v51  ;;  %v145_v6 = vmax.bf16 %v125_v54, %v65_v52  ;;  %v41_v9 = vld [vmem:[%s683_s1 + $0x88] sm:$0xff]  ;;  %v361_v12 = vcombine.high %v146_v58, %v147_v59  ;;  %v360_v20 = vcombine.low %v146_v58, %v147_v59 }
  0x1a   :  { %v142_v8 = vmax.bf16 %v122_v62, %v102_v61  ;;  %v61_v10 = vld [vmem:[%s684_s2 + $0x88] sm:$0xff]  ;;  %v100_v11 = vld [vmem:[%s685_s3 + $0x80] sm:$0xff]  ;;  %v143_v14 = vmax.bf16 %v123_v1, %v103_v0  ;;  %v80_v23 = vmax.bf16 %v60_v4, %v40_v3 }
  0x1b   :  { %v101_v15 = vld [vmem:[%s685_s3 + $0x88] sm:$0xff]  ;;  %v120_v17 = vld [vmem:[%s686_s4 + $0x80] sm:$0xff]  ;;  %v359_v21 = vcombine.high %v144_v5, %v145_v6  ;;  %v81_v26 = vmax.bf16 %v61_v10, %v41_v9  ;;  %v358_v29 = vcombine.low %v144_v5, %v145_v6 }
  0x1c   :  { %300 = vmatpush1.bf16.msra.mxu0 %v364_v49  ;;  %v387_v16 = vld [vmem:[%s687_s0 + $0x4] ss:$8 sps:$4 sm:$0xff]   ;;  %v162_v22 = vmax.bf16 %v142_v8, %v82_v7  ;;  %v163_v25 = vmax.bf16 %v143_v14, %v83_v13  ;;  %v140_v27 = vmax.bf16 %v120_v17, %v100_v11  ;;  %v385_v36 = vld [vmem:[%s687_s0] ss:$8 sps:$4 sm:$0xff]  }
  0x1d   :  { %301 = vmatprep.subr.bf16.mxu0 %v363_v57  ;;  %v121_v18 = vld [vmem:[%s686_s4 + $0x88] sm:$0xff]  ;;  %v166_v19 = vld [vmem:[%s688_s5] sm:$0xff]  ;;  %378 = vmatprep.mubr.msk.bf16.mxu0 %vm287_vm0, %v387_v16 }
  0x1e   :  { %170 = vperm.xlu0 %384, %v166_v19   ;;  %v167_v24 = vld [vmem:[%s688_s5 + $0x8] sm:$0xff]  ;;  %v141_v28 = vmax.bf16 %v121_v18, %v101_v15  ;;  %v377_v30 = vcombine.high %v162_v22, %v163_v25  ;;  %v160_v31 = vmax.bf16 %v140_v27, %v80_v23  ;;  %v376_v33 = vcombine.low %v162_v22, %v163_v25 }
  0x20   :  { %302 = vmatpush1.bf16.msra.mxu0 %v362_v2  ;;  %v161_v32 = vmax.bf16 %v141_v28, %v81_v26 }
  0x21   :  { %303 = vmatprep.subr.bf16.mxu0 %v361_v12 }
  0x22   :  { %175 = vperm.xlu0 %384, %v167_v24   ;;  %v375_v34 = vcombine.high %v160_v31, %v161_v32  ;;  %v374_v35 = vcombine.low %v160_v31, %v161_v32 }
  0x24   :  { %304 = vmatpush1.bf16.msra.mxu0 %v360_v20 }
  0x25   :  { %305 = vmatprep.subr.bf16.mxu0 %v359_v21 }
  0x28   :  { %306 = vmatpush1.bf16.msra.mxu0 %v358_v29 }
  0x29   :  { %319 = vmatprep.subr.bf16.mxu0 %v377_v30 }
  0x2c   :  { %320 = vmatpush2.bf16.msra.mxu0 %v376_v33 }
  0x2d   :  { %321 = vmatprep.subr.bf16.mxu0 %v375_v34 }
  0x30   :  { %322 = vmatpush2.bf16.msra.mxu0 %v374_v35 }
  0x33   :  { %324 = vmatmul.mubr.bf16.vlgmr.msra.gmra.mxu0 %v385_v36 }
  0x99   :  { %v171_v37 = vpop.permute.xlu0 %170 }
  0x9d   :  { %v176_v42 = vpop.permute.xlu0 %175 }
  0xf3   :  { %v325_v38 = vpop.f32.mrf.mxu0 }
  0xf4   :  { %v326_v39 = vadd.f32 %v325_v38, %v171_v37 }
  0xf5   :  { %v327_v40 = vpop.f32.mrf.mxu0 }
  0xf6   :  { %v328_v41 = vadd.f32 %v327_v40, %v171_v37  ;;  %v334_v44 = vmax.f32 %v326_v39, 0.0 }
  0xf7   :  { %v329_v43 = vpop.f32.mrf.mxu0 }
  0xf8   :  { %v335_v45 = vmax.f32 %v328_v41, 0.0  ;;  %v330_v46 = vadd.f32 %v329_v43, %v176_v42 }
  0xf9   :  { %v331_v47 = vpop.f32.mrf.mxu0 }
  0xfa   :  { %v381_v48 = vpack.c.bf16 %v335_v45, %v334_v44  ;;  %v332_v49 = vadd.f32 %v331_v47, %v176_v42  ;;  %v336_v50 = vmax.f32 %v330_v46, 0.0 }
  0xfc   :  { %350 = vst [vmem:[%s689_s6] sm:$0xff] %v381_v48  ;;  %v337_v51 = vmax.f32 %v332_v49, 0.0 }
  0xfe   :  { %v382_v52 = vpack.c.bf16 %v337_v51, %v336_v50 }
 0x100   :  { %351 = vst [vmem:[%s689_s6 + $0x8] sm:$0xff] %v382_v52 }

// kernel: net_forward.5
= control target key start
LH: loop header
LB: loop body
LE: loop exit
PB: predicated region body
PF: predicated region fallthrough
CT: control target
= control target key end

     0   :  { %v758_v0 = vmov 0   ;;  %vm264_vm0 = vcmask 130048   ;;  %v759_v44 = vmov 0.0   ;;  %vm760_vm1 = vmmov 0   ;;  %s987_s1 = inlined_call_operand.vmem [shape: bf16[400,128], index: 1, kind: input, shape index: {}]   ;;  %s988_s0 = inlined_call_operand.vmem [shape: bf16[4,8,400], index: 0, kind: input, shape index: {}]   ;;  %s989_s3 = inlined_call_operand.vmem [shape: bf16[128,128], index: 3, kind: input, shape index: {}]   ;;  %s990_s5 = inlined_call_operand.vmem [shape: bf16[128,128], index: 5, kind: input, shape index: {}]   ;;  %s991_s2 = inlined_call_operand.vmem [shape: f32[1,128], index: 2, kind: input, shape index: {}]   ;;  %s992_s4 = inlined_call_operand.vmem [shape: f32[1,128], index: 4, kind: input, shape index: {}]   ;;  %s993_s6 = inlined_call_operand.vmem [shape: f32[1,128], index: 6, kind: input, shape index: {}]   ;;  %s994_s7 = inlined_call_operand.vmem [shape: f32[8,128], index: 7, kind: output, shape index: {}]  }
   0x1   :  { %308 = vmatprep.subr.bf16.mxu1 %v758_v0  ;;  %v717_v1 = vld [vmem:[%s987_s1 + $0x78] sm:$0xff]   ;;  %v720_v4 = vld [vmem:[%s987_s1 + $0x70] sm:$0xff]   ;;  %v723_v7 = vld [vmem:[%s987_s1 + $0x68] sm:$0xff]  }
   0x2   :  { %v718_v2 = vld [vmem:[%s987_s1 + $0xb8] sm:$0xff]   ;;  %634 = vmatprep.subr.bf16.mxu0 %v717_v1  ;;  %v721_v5 = vld [vmem:[%s987_s1 + $0xb0] sm:$0xff]   ;;  %v724_v8 = vld [vmem:[%s987_s1 + $0xa8] sm:$0xff]  }
   0x3   :  { %v719_v3 = vld [vmem:[%s987_s1 + $0x38] sm:$0xff]   ;;  %309 = vmatpush1.bf16.msra.mxu1 %v718_v2  ;;  %v722_v6 = vld [vmem:[%s987_s1 + $0x30] sm:$0xff]   ;;  %v725_v9 = vld [vmem:[%s987_s1 + $0x28] sm:$0xff]  }
   0x4   :  { %635 = vmatpush3.bf16.msra.mxu0 %v719_v3  ;;  %310 = vmatprep.subr.bf16.mxu1 %v758_v0  ;;  %v726_v10 = vld [vmem:[%s987_s1 + $0x60] sm:$0xff]   ;;  %v729_v13 = vld [vmem:[%s987_s1 + $0x58] sm:$0xff]   ;;  %v732_v16 = vld [vmem:[%s987_s1 + $0x50] sm:$0xff]  }
   0x5   :  { %636 = vmatprep.subr.bf16.mxu0 %v720_v4  ;;  %v727_v11 = vld [vmem:[%s987_s1 + $0xa0] sm:$0xff]   ;;  %v730_v14 = vld [vmem:[%s987_s1 + $0x98] sm:$0xff]   ;;  %v733_v17 = vld [vmem:[%s987_s1 + $0x90] sm:$0xff]  }
   0x6   :  { %v728_v12 = vld [vmem:[%s987_s1 + $0x20] sm:$0xff]   ;;  %v731_v15 = vld [vmem:[%s987_s1 + $0x18] sm:$0xff]   ;;  %v734_v18 = vld [vmem:[%s987_s1 + $0x10] sm:$0xff]  }
   0x7   :  { %311 = vmatpush1.bf16.msra.mxu1 %v721_v5  ;;  %v735_v19 = vld [vmem:[%s987_s1 + $0x48] sm:$0xff]   ;;  %v738_v22 = vld [vmem:[%s987_s1 + $0x40] sm:$0xff]   ;;  %v579_v24 = vld [vmem:[%s988_s0 + $0x10] sm:$0xff] }
   0x8   :  { %637 = vmatpush3.bf16.msra.mxu0 %v722_v6  ;;  %312 = vmatprep.subr.bf16.mxu1 %v758_v0  ;;  %v736_v20 = vld [vmem:[%s987_s1 + $0x88] sm:$0xff]   ;;  %v27_v23 = vld [vmem:[%s988_s0] sm:$0xff]  ;;  %v583_v27 = vld [vmem:[%s988_s0 + $0x30] sm:$0xff] }
   0x9   :  { %638 = vmatprep.subr.bf16.mxu0 %v723_v7  ;;  %v737_v21 = vld [vmem:[%s987_s1 + $0x8] sm:$0xff]   ;;  %v581_v25 = vld [vmem:[%s988_s0 + $0x20] sm:$0xff]  ;;  %v32_v26 = vmax.bf16 %v579_v24, %v27_v23  ;;  %v580_v31 = vld [vmem:[%s988_s0 + $0x18] sm:$0xff] }
   0xa   :  { %v739_v28 = vld [vmem:[%s987_s1 + $0x80] sm:$0xff]   ;;  %v40_v29 = vmax.bf16 %v583_v27, %v581_v25  ;;  %v28_v30 = vld [vmem:[%s988_s0 + $0x8] sm:$0xff]  ;;  %v584_v34 = vld [vmem:[%s988_s0 + $0x38] sm:$0xff] }
   0xb   :  { %313 = vmatpush1.bf16.msra.mxu1 %v724_v8  ;;  %v33_v32 = vmax.bf16 %v580_v31, %v28_v30  ;;  %v582_v33 = vld [vmem:[%s988_s0 + $0x28] sm:$0xff]  ;;  %v740_v35 = vld [vmem:[%s987_s1] sm:$0xff]   ;;  %v742_v43 = vld [vmem:[%s989_s3 + $0x38] sm:$0xff]  }
   0xc   :  { %639 = vmatpush3.bf16.msra.mxu0 %v725_v9  ;;  %314 = vmatprep.subr.bf16.mxu1 %v758_v0  ;;  %v42_v36 = vmax.bf16 %v40_v29, %v32_v26  ;;  %v41_v37 = vmax.bf16 %v584_v34, %v582_v33  ;;  %v741_v41 = vld [vmem:[%s987_s1 + $0xc0] sm:$0xff]   ;;  %v743_v46 = vld [vmem:[%s989_s3 + $0x30] sm:$0xff]   ;;  %v744_v47 = vld [vmem:[%s989_s3 + $0x28] sm:$0xff]  }
   0xd   :  { %640 = vmatprep.subr.bf16.mxu0 %v726_v10  ;;  %v745_v48 = vld [vmem:[%s989_s3 + $0x20] sm:$0xff]   ;;  %v746_v49 = vld [vmem:[%s989_s3 + $0x18] sm:$0xff]   ;;  %v747_v50 = vld [vmem:[%s989_s3 + $0x10] sm:$0xff]  }
   0xe   :  { %v587_v38 = vcombine.high %v42_v36, %v42_v36  ;;  %v43_v39 = vmax.bf16 %v41_v37, %v33_v32  ;;  %v586_v40 = vcombine.low %v42_v36, %v42_v36  ;;  %v748_v51 = vld [vmem:[%s989_s3 + $0x8] sm:$0xff]   ;;  %v749_v52 = vld [vmem:[%s989_s3] sm:$0xff]   ;;  %v750_v53 = vld [vmem:[%s990_s5 + $0x38] sm:$0xff]  }
   0xf   :  { %315 = vmatpush1.bf16.msra.mxu1 %v727_v11  ;;  %v751_v54 = vld [vmem:[%s990_s5 + $0x30] sm:$0xff]   ;;  %v752_v55 = vld [vmem:[%s990_s5 + $0x28] sm:$0xff]   ;;  %v753_v56 = vld [vmem:[%s990_s5 + $0x20] sm:$0xff]  }
  0x10   :  { %641 = vmatpush3.bf16.msra.mxu0 %v728_v12  ;;  %316 = vmatprep.subr.bf16.mxu1 %v758_v0  ;;  %v589_v42 = vcombine.high %v43_v39, %v43_v39  ;;  %v588_v45 = vcombine.low %v43_v39, %v43_v39  ;;  %v754_v57 = vld [vmem:[%s990_s5 + $0x18] sm:$0xff]   ;;  %v755_v58 = vld [vmem:[%s990_s5 + $0x10] sm:$0xff]   ;;  %v585_v61 = vld [vmem:[%s991_s2] ss:$0 sm:$0xff] }
  0x11   :  { %642 = vmatprep.subr.bf16.mxu0 %v729_v13  ;;  %300 = vmatprep.mubr.bf16.mxu0 %v587_v38  ;;  %v756_v9 = vld [vmem:[%s990_s5 + $0x8] sm:$0xff]   ;;  %v757_v10 = vld [vmem:[%s990_s5] sm:$0xff]  }
  0x12   :  { %615 = vmatprep.mubr.msk.bf16.mxu1 %vm264_vm0, %v589_v42  ;;  %v616_v11 = vld [vmem:[%s992_s4] ss:$0 sm:$0xff] }
  0x13   :  { %317 = vmatpush1.bf16.msra.mxu1 %v730_v14 }
  0x14   :  { %643 = vmatpush3.bf16.msra.mxu0 %v731_v15  ;;  %318 = vmatprep.subr.bf16.mxu1 %v758_v0 }
  0x15   :  { %644 = vmatprep.subr.bf16.mxu0 %v732_v16 }
  0x17   :  { %319 = vmatpush1.bf16.msra.mxu1 %v733_v17 }
  0x18   :  { %645 = vmatpush3.bf16.msra.mxu0 %v734_v18  ;;  %320 = vmatprep.subr.bf16.mxu1 %v758_v0 }
  0x19   :  { %646 = vmatprep.subr.bf16.mxu0 %v735_v19  ;;  %v625_v19 = vld [vmem:[%s993_s6] ss:$0 sm:$0xff] }
  0x1b   :  { %321 = vmatpush1.bf16.msra.mxu1 %v736_v20 }
  0x1c   :  { %647 = vmatpush3.bf16.msra.mxu0 %v737_v21  ;;  %322 = vmatprep.subr.bf16.mxu1 %v758_v0 }
  0x1d   :  { %648 = vmatprep.subr.bf16.mxu0 %v738_v22 }
  0x1f   :  { %323 = vmatpush1.bf16.msra.mxu1 %v739_v28 }
  0x20   :  { %649 = vmatpush3.bf16.msra.mxu0 %v740_v35  ;;  %338 = vmatprep.subr.bf16.mxu1 %v758_v0 }
  0x21   :  { %674 = vmatprep.subr.bf16.mxu0 %v759_v44 }
  0x23   :  { %301 = vmatmul.mubr.bf16.vlgmr.msra.gmra.mxu0 %v586_v40  ;;  %339 = vmatpush2.bf16.msra.mxu1 %v741_v41 }
  0x24   :  { %675 = vmatpush3.bf16.msra.mxu0 %v742_v43  ;;  %694 = vmatprep.subr.bf16.mxu1 %v759_v44 }
  0x25   :  { %676 = vmatprep.subr.bf16.mxu0 %v759_v44  ;;  %690 = vmatprep.mubr.msk.bf16.mxu0 %vm760_vm1, %v759_v44 }
  0x26   :  { %341 = vmatmul.mubr.bf16.vlgmr.msra.gmra.mxu1 %v588_v45 }
  0x27   :  { %710 = vmatprep.mubr.msk.bf16.mxu1 %vm760_vm1, %v759_v44  ;;  %695 = vmatpush3.bf16.msra.mxu1 %v750_v53 }
  0x28   :  { %677 = vmatpush3.bf16.msra.mxu0 %v743_v46  ;;  %696 = vmatprep.subr.bf16.mxu1 %v759_v44 }
  0x29   :  { %678 = vmatprep.subr.bf16.mxu0 %v759_v44 }
  0x2b   :  { %697 = vmatpush3.bf16.msra.mxu1 %v751_v54 }
  0x2c   :  { %679 = vmatpush3.bf16.msra.mxu0 %v744_v47  ;;  %698 = vmatprep.subr.bf16.mxu1 %v759_v44 }
  0x2d   :  { %680 = vmatprep.subr.bf16.mxu0 %v759_v44 }
  0x2f   :  { %699 = vmatpush3.bf16.msra.mxu1 %v752_v55 }
  0x30   :  { %681 = vmatpush3.bf16.msra.mxu0 %v745_v48  ;;  %700 = vmatprep.subr.bf16.mxu1 %v759_v44 }
  0x31   :  { %682 = vmatprep.subr.bf16.mxu0 %v759_v44 }
  0x33   :  { %701 = vmatpush3.bf16.msra.mxu1 %v753_v56 }
  0x34   :  { %683 = vmatpush3.bf16.msra.mxu0 %v746_v49  ;;  %702 = vmatprep.subr.bf16.mxu1 %v759_v44 }
  0x35   :  { %684 = vmatprep.subr.bf16.mxu0 %v759_v44 }
  0x37   :  { %703 = vmatpush3.bf16.msra.mxu1 %v754_v57 }
  0x38   :  { %685 = vmatpush3.bf16.msra.mxu0 %v747_v50  ;;  %704 = vmatprep.subr.bf16.mxu1 %v759_v44 }
  0x39   :  { %686 = vmatprep.subr.bf16.mxu0 %v759_v44 }
  0x3b   :  { %705 = vmatpush3.bf16.msra.mxu1 %v755_v58 }
  0x3c   :  { %687 = vmatpush3.bf16.msra.mxu0 %v748_v51  ;;  %706 = vmatprep.subr.bf16.mxu1 %v759_v44 }
  0x3d   :  { %688 = vmatprep.subr.bf16.mxu0 %v759_v44 }
  0x3f   :  { %707 = vmatpush3.bf16.msra.mxu1 %v756_v9 }
  0x40   :  { %689 = vmatpush3.bf16.msra.mxu0 %v749_v52  ;;  %708 = vmatprep.subr.bf16.mxu1 %v759_v44 }
  0x43   :  { %709 = vmatpush3.bf16.msra.mxu1 %v757_v10 }
  0xe3   :  { %v650_v59 = vpop.f32.mrf.mxu0 }
  0xe5   :  { %v651_v60 = vpop.f32.mrf.mxu0 }
  0xe6   :  { %v652_v62 = vadd.f32 %v651_v60, %v650_v59  ;;  %v342_v63 = vpop.f32.mrf.mxu1 }
  0xe7   :  { %v653_v0 = vpop.f32.mrf.mxu0 }
  0xe8   :  { %v303_v1 = vadd.f32 %v652_v62, %v585_v61  ;;  %v344_v2 = vpop.f32.mrf.mxu1 }
  0xe9   :  { %v654_v3 = vpop.f32.mrf.mxu0 }
  0xea   :  { %v343_v4 = vadd.f32 %v342_v63, %v303_v1  ;;  %v345_v5 = vpop.f32.mrf.mxu1 }
  0xec   :  { %v348_v6 = vmax.f32 %v343_v4, 0.0  ;;  %v346_v7 = vpop.f32.mrf.mxu1 }
  0xee   :  { %v349_v8 = vpack.c.bf16 %v348_v6, %v348_v6 }
  0xf0   :  { %691 = vmatmul.mubr.bf16.vlgmr.msra.gmra.mxu0 %v349_v8 }
 0x1b0   :  { %v455_v12 = vpop.f32.mrf.mxu0 }
 0x1b1   :  { %v456_v13 = vadd.f32 %v616_v11, %v455_v12 }
 0x1b2   :  { %v692_v14 = vpop.f32.mrf.mxu0 }
 0x1b3   :  { %v461_v15 = vmax.f32 %v456_v13, 0.0 }
 0x1b4   :  { %v458_v16 = vpop.f32.mrf.mxu0 }
 0x1b5   :  { %v462_v17 = vpack.c.bf16 %v461_v15, %v461_v15 }
 0x1b6   :  { %v693_v18 = vpop.f32.mrf.mxu0 }
 0x1b7   :  { %711 = vmatmul.mubr.bf16.vlgmr.msra.gmra.mxu1 %v462_v17 }
 0x277   :  { %v568_v20 = vpop.f32.mrf.mxu1 }
 0x278   :  { %v569_v21 = vadd.f32 %v625_v19, %v568_v20 }
 0x279   :  { %v712_v22 = vpop.f32.mrf.mxu1 }
 0x27a   :  { %574 = vst [vmem:[%s994_s7] sm:$0xff] %v569_v21 }
 0x27b   :  { %v571_v23 = vpop.f32.mrf.mxu1 }
 0x27d   :  { %v713_v24 = vpop.f32.mrf.mxu1 }

</bundles_post_ra>
